<compile_context>
chip_gen: v5e
topology: v5e:2x2
jax: 0.10.0
libtpu: 0.0.40
codegen_flags: <defaults>
</compile_context>

<pallas_src>
import functools

import jax
import jax.numpy as jnp
from jax import lax
from jax.experimental import pallas as pl
from jax.experimental.pallas import tpu as pltpu

LATENT = 128   # latent_dim
C0 = 128       # fc/conv2 output channels
C1 = 64        # conv1 output channels
HW = 8         # spatial size of the fc feature map
OUT_CH = 3
NEG_SLOPE = 0.2        # nn.LeakyReLU(0.2) per get_act('lrelu')
BN_EPS = 1e-5


# ----------------------------------------------------------------------------
# helpers
# ----------------------------------------------------------------------------
def _full_spec(a):
    nd = a.ndim
    return pl.BlockSpec(a.shape, lambda *_: (0,) * nd)


# Polyphase tables for ConvTranspose2d(k=3, s=2, p=1, output_padding=1):
# output phase r (= oy mod 2) pulls input row p+dp with kernel tap ky.
_PHASE1 = {0: {0: 1}, 1: {0: 2, 1: 0}}
# deconv1-then-deconv2 composed: final phase u (= oy mod 4) pulls deconv1
# phase r at 8-grid row p+dp with deconv2 tap ky.
_PHASE2 = {
    0: (((0, 0), 1),),
    1: (((0, 0), 2), ((1, 0), 0)),
    2: (((1, 0), 1),),
    3: (((1, 0), 2), ((0, 1), 0)),
}
_DPQ = ((0, 0), (0, 1), (1, 0), (1, 1))


def _pack_fc(w, b):
    """nn.Linear weight (8192,128)/bias: permute cols from (c*64+s) to (s*128+c)."""
    wk = jnp.transpose(w.reshape(C0, HW * HW, LATENT), (2, 1, 0)).reshape(LATENT, HW * HW * C0)
    bk = jnp.transpose(b.reshape(C0, HW * HW)).reshape(1, HW * HW * C0)
    return wk.astype(jnp.bfloat16), bk.astype(jnp.float32)


def _pack_conv(w, b, gamma, beta, mean, var):
    """Fold eval-mode BatchNorm into the conv; pack 3x3 taps as (9, Cout, Cin)."""
    scale = gamma / jnp.sqrt(var + BN_EPS)
    taps = jnp.transpose(w, (2, 3, 0, 1)) * scale[None, None, :, None]   # (3,3,Cout,Cin)
    taps = taps.reshape(9, w.shape[0], w.shape[1])
    bias = (b - mean) * scale + beta
    return taps.astype(jnp.bfloat16), bias.reshape(-1, 1).astype(jnp.float32)


def _pack_deconv1(w, b):
    """ConvTranspose2d(128,3,...) weight (Cin,Cout,3,3) -> (16, 4*Cin) phase matrix."""
    cin = w.shape[0]
    blocks = []
    for dp, dq in _DPQ:
        rows = []
        for r in (0, 1):
            for s in (0, 1):
                if dp in _PHASE1[r] and dq in _PHASE1[s]:
                    ky, kx = _PHASE1[r][dp], _PHASE1[s][dq]
                    rows.append(w[:, :, ky, kx].T)                     # (3, Cin)
                else:
                    rows.append(jnp.zeros((3, cin), jnp.float32))
        blocks.append(jnp.concatenate(rows, axis=0))                   # (12, Cin)
    mat = jnp.concatenate(blocks, axis=1)                              # (12, 4*Cin)
    mat = jnp.pad(mat, ((0, 4), (0, 0)))                               # pad rows 12 -> 16
    bias = jnp.pad(jnp.tile(b, 4), (0, 4)).reshape(16, 1)
    return mat.astype(jnp.bfloat16), bias.astype(jnp.float32)


def _pack_deconv2(w, b):
    """deconv2 composed with deconv1's 2x2 phases -> one fused (48, 64) matrix."""
    def find(table, r, dp):
        for (rr, dd), k in table:
            if rr == r and dd == dp:
                return k
        return None

    blocks = []
    for dp, dq in _DPQ:
        rows = []
        for u in range(4):
            for v in range(4):
                cols = []
                for r in (0, 1):
                    for s in (0, 1):
                        ky = find(_PHASE2[u], r, dp)
                        kx = find(_PHASE2[v], s, dq)
                        if ky is not None and kx is not None:
                            cols.append(w[:, :, ky, kx].T)             # (3, 3): [c, co]
                        else:
                            cols.append(jnp.zeros((3, 3), jnp.float32))
                rows.append(jnp.concatenate(cols, axis=1))             # (3, 12)
        blk = jnp.concatenate(rows, axis=0)                            # (48, 12)
        blocks.append(jnp.pad(blk, ((0, 0), (0, 4))))                  # (48, 16)
    mat = jnp.concatenate(blocks, axis=1)                              # (48, 64)
    bias = jnp.tile(b, 16).reshape(48, 1)
    return mat.astype(jnp.bfloat16), bias.astype(jnp.float32)


# ----------------------------------------------------------------------------
# fused decoder kernel
# ----------------------------------------------------------------------------
def _decoder_kernel(z_ref, fcw_ref, fcb_ref, w1_ref, b1_ref, w2_ref, b2_ref,
                    dw1_ref, d1b_ref, a2_ref, d2b_ref, out_ref, *, np_roll):
    f32, bf16 = jnp.float32, jnp.bfloat16
    NB = out_ref.shape[1]                       # B * 64, lane axis everywhere

    # lane-index helpers: col = b*64 + p*8 + q
    col = lax.broadcasted_iota(jnp.int32, (1, NB), 1)
    qq = col % HW
    pp = (col // HW) % HW

    def shift(x, dy, dx):
        """out[:, col(p,q)] = x[:, col(p+dy, q+dx)] if on the 8x8 grid, else 0."""
        if dy == 0 and dx == 0:
            return x
        d = dy * HW + dx
        amount = (-d) % NB if np_roll else d % NB
        y = pltpu.roll(x, amount, 1)                       # exact lane rotation (XLU)
        conds = []
        if dx > 0:
            conds.append(qq <= HW - 1 - dx)
        elif dx < 0:
            conds.append(qq >= -dx)
        if dy > 0:
            conds.append(pp <= HW - 1 - dy)
        elif dy < 0:
            conds.append(pp >= -dy)
        valid = conds[0]
        for c in conds[1:]:
            valid = jnp.logical_and(valid, c)
        return jnp.where(valid, y, jnp.zeros_like(y))

    def leaky(v):
        return jnp.where(v > 0, v, NEG_SLOPE * v)

    def conv3x3(x_bf, w_ref, b_ref):
        acc = None
        for ky in range(3):
            for kx in range(3):
                t = jnp.dot(w_ref[ky * 3 + kx], shift(x_bf, ky - 1, kx - 1),
                            preferred_element_type=f32)
                acc = t if acc is None else acc + t
        return acc + b_ref[...]

    # ---- fc_decode: bf16 MXU matmul, f32 accumulation -----------------------
    h = jnp.dot(z_ref[...].astype(bf16), fcw_ref[...],
                preferred_element_type=f32) + fcb_ref[...]             # (B, 64*128)
    # fc_w columns are pre-permuted to (spatial, channel); one reshape plus a
    # 2-D transpose makes everything channel-major: rows = channel, lanes = NB.
    x_cm = h.reshape(NB, C0).T                                         # (128, NB) f32
    x_bf = x_cm.astype(bf16)

    # ---- CNNBlock 1: 3x3 conv + folded BN + LeakyReLU (Dropout = identity) --
    o1 = leaky(conv3x3(x_bf, w1_ref, b1_ref))                          # (64, NB) f32
    # ---- CNNBlock 2 + residual with the fc output ----------------------------
    o2 = leaky(conv3x3(o1.astype(bf16), w2_ref, b2_ref))               # (128, NB) f32
    act = (o2 + x_cm).astype(bf16)                                     # (128, NB)

    # ---- deconv1 (k3,s2,p1,op1): polyphase over 2x2 output phases ------------
    qin = jnp.concatenate(
        [act, shift(act, 0, 1), shift(act, 1, 0), shift(act, 1, 1)], axis=0)   # (512, NB)
    d1t = jnp.dot(dw1_ref[...], qin, preferred_element_type=f32) + d1b_ref[...]  # (16, NB)

    # ---- deconv2 composed with deconv1's phases: one (48,64)@(64,NB) matmul --
    qb = d1t.astype(bf16)
    q2 = jnp.concatenate(
        [qb, shift(qb, 0, 1), shift(qb, 1, 0), shift(qb, 1, 1)], axis=0)        # (64, NB)
    pre = jnp.dot(a2_ref[...], q2, preferred_element_type=f32) + d2b_ref[...]   # (48, NB)
    out_ref[...] = jax.nn.sigmoid(pre).astype(out_ref.dtype)           # lane-dense store


# ----------------------------------------------------------------------------
# roll-convention probe (one-off, cached): makes the lane shifts robust to the
# rotation-direction convention of pltpu.roll.
# ----------------------------------------------------------------------------
_ROLL_NP_CONV = None


def _roll_is_numpy_convention():
    global _ROLL_NP_CONV
    if _ROLL_NP_CONV is None:
        def probe(x_ref, o_ref):
            o_ref[...] = pltpu.roll(x_ref[...], 1, 1)

        x = jnp.tile(jnp.arange(128, dtype=jnp.float32)[None, :], (8, 1))
        y = pl.pallas_call(
            probe,
            out_shape=jax.ShapeDtypeStruct((8, 128), jnp.float32),
            in_specs=[_full_spec(x)],
            out_specs=pl.BlockSpec((8, 128), lambda *_: (0, 0)),
        )(x)
        _ROLL_NP_CONV = bool(y[0, 0] > 64.0)   # np.roll convention: y[0,0] == 127
    return _ROLL_NP_CONV


# ----------------------------------------------------------------------------
# parameters and forward
# ----------------------------------------------------------------------------
def init_params(key):
    keys = iter(jax.random.split(key, 32))

    def nrm(shape, s=0.05):
        return (s * jax.random.normal(next(keys), shape)).astype(jnp.float32)

    raw = {
        "fc_w": nrm((C0 * HW * HW, LATENT)),
        "fc_b": nrm((C0 * HW * HW,)),
        "d1_w": nrm((C0, OUT_CH, 3, 3)),       # ConvTranspose2d weight (Cin,Cout,kh,kw)
        "d1_b": nrm((OUT_CH,)),
        "d2_w": nrm((OUT_CH, OUT_CH, 3, 3)),
        "d2_b": nrm((OUT_CH,)),
    }
    for name, cin, cout in (("conv1", C0, C1), ("conv2", C1, C0)):
        raw[name] = {
            "w": nrm((cout, cin, 3, 3)),
            "b": nrm((cout,)),
            "gamma": 1.0 + nrm((cout,)),
            "beta": nrm((cout,)),
            "mean": nrm((cout,)),
            "var": 1.0 + jnp.abs(nrm((cout,))),
        }

    fc_w, fc_b = _pack_fc(raw["fc_w"], raw["fc_b"])
    w1, b1 = _pack_conv(**raw["conv1"])
    w2, b2 = _pack_conv(**raw["conv2"])
    d1_w, d1_b = _pack_deconv1(raw["d1_w"], raw["d1_b"])
    d2_a, d2_b = _pack_deconv2(raw["d2_w"], raw["d2_b"])
    packed = dict(fc_w=fc_w, fc_b=fc_b, w1=w1, b1=b1, w2=w2, b2=b2,
                  d1_w=d1_w, d1_b=d1_b, d2_a=d2_a, d2_b=d2_b)
    return raw, packed


@functools.partial(jax.jit, static_argnames=("np_roll",))
def _forward_impl(packed, z, np_roll):
    B = z.shape[0]
    NB = B * HW * HW
    args = (z, packed["fc_w"], packed["fc_b"], packed["w1"], packed["b1"],
            packed["w2"], packed["b2"], packed["d1_w"], packed["d1_b"],
            packed["d2_a"], packed["d2_b"])

    out48 = pl.pallas_call(
        functools.partial(_decoder_kernel, np_roll=np_roll),
        out_shape=jax.ShapeDtypeStruct((48, NB), jnp.float32),
        in_specs=[_full_spec(a) for a in args],
        out_specs=pl.BlockSpec((48, NB), lambda *_: (0, 0)),
        cost_estimate=pl.CostEstimate(
            flops=45_000_000, transcendentals=48 * NB, bytes_accessed=2_500_000),
    )(*args)

    # rows: (u*4+v)*3 + c ; cols: b*64 + P*8 + Q  ->  image[b, c, 4P+u, 4Q+v]
    o = out48.reshape(4, 4, OUT_CH, B, HW, HW)
    return jnp.transpose(o, (3, 2, 4, 0, 5, 1)).reshape(B, OUT_CH, 4 * HW, 4 * HW)


def decoder_forward(packed, z):
    return _forward_impl(packed, z, np_roll=_roll_is_numpy_convention())


# ----------------------------------------------------------------------------
# pure-JAX f32 reference (eval-mode semantics), for an in-script check
# ----------------------------------------------------------------------------
def reference_forward(raw, z):
    prec = lax.Precision.HIGHEST
    B = z.shape[0]
    x = jnp.dot(z, raw["fc_w"].T, precision=prec) + raw["fc_b"]
    x = x.reshape(B, C0, HW, HW)
    identity = x

    def cnn_block(x, p):
        y = lax.conv_general_dilated(
            x, p["w"], window_strides=(1, 1), padding=((1, 1), (1, 1)),
            dimension_numbers=("NCHW", "OIHW", "NCHW"), precision=prec)
        y = y + p["b"][None, :, None, None]
        scale = (p["gamma"] / jnp.sqrt(p["var"] + BN_EPS))[None, :, None, None]
        y = scale * (y - p["mean"][None, :, None, None]) + p["beta"][None, :, None, None]
        return jnp.where(y > 0, y, NEG_SLOPE * y)

    x = cnn_block(x, raw["conv1"])
    x = cnn_block(x, raw["conv2"])
    x = x + identity

    def deconv(x, w, b):   # ConvTranspose2d(k=3, s=2, p=1, output_padding=1)
        wk = jnp.flip(w, axis=(2, 3)).transpose(1, 0, 2, 3)
        y = lax.conv_general_dilated(
            x, wk, window_strides=(1, 1), padding=((1, 2), (1, 2)),
            lhs_dilation=(2, 2), dimension_numbers=("NCHW", "OIHW", "NCHW"),
            precision=prec)
        return y + b[None, :, None, None]

    x = deconv(x, raw["d1_w"], raw["d1_b"])
    x = deconv(x, raw["d2_w"], raw["d2_b"])
    return jax.nn.sigmoid(x)


if __name__ == "__main__":
    key = jax.random.PRNGKey(0)
    pkey, zkey = jax.random.split(key)
    raw, packed = init_params(pkey)
    z = jax.random.normal(zkey, (2, LATENT), jnp.float32)      # (batch, latent_dim)

    out = jax.block_until_ready(decoder_forward(packed, z))

    assert out.shape == (2, OUT_CH, 32, 32), out.shape
    assert out.dtype == jnp.float32
    assert bool(jnp.all(jnp.isfinite(out)))
    assert bool(jnp.all((out >= 0.0) & (out <= 1.0)))          # sigmoid range

    ref = reference_forward(raw, z)
    err = float(jnp.max(jnp.abs(out - ref)))
    assert err < 2e-2, f"max|pallas - f32 reference| = {err}"
    print("KERNEL_OK")
</pallas_src>

<mosaic_0001>
module attributes {stable_mosaic.version = 11 : i64} {
  func.func @probe(%arg0: memref<8x128xf32, #tpu.memory_space<vmem>>, %arg1: memref<8x128xf32, #tpu.memory_space<vmem>>) attributes {dimension_semantics = [], scalar_prefetch = 0 : i64, scratch_operands = 0 : i64, tpu.core_type = #tpu.core_type<tc>} {
    %c0 = arith.constant 0 : index
    %c0_0 = arith.constant 0 : index
    %0 = vector.load %arg0[%c0, %c0_0] : memref<8x128xf32, #tpu.memory_space<vmem>>, vector<8x128xf32>
    %c1_i32 = arith.constant 1 : i32
    %1 = tpu.dynamic_rotate %0 by %c1_i32 dim 1 : vector<8x128xf32>, i32 -> vector<8x128xf32>
    %c0_1 = arith.constant 0 : index
    %c0_2 = arith.constant 0 : index
    %2 = vector.load %arg1[%c0_1, %c0_2] : memref<8x128xf32, #tpu.memory_space<vmem>>, vector<8x128xf32>
    tpu.vector_store %arg1[%c0_1, %c0_2], %1 {strides = array<i32>} : memref<8x128xf32, #tpu.memory_space<vmem>>, vector<8x128xf32>,
    return
  }
}

</mosaic_0001>

<bundles_post_ra>
// kernel: tpu_custom_call.1
= control target key start
LH: loop header
LB: loop body
LE: loop exit
PB: predicated region body
PF: predicated region fallthrough
CT: control target
= control target key end

     0   :  { %6 = vsyncpa [#allocation3], 0  ;;  %s118_s0 = inlined_call_operand.hbm [shape: f32[8,128], index: 0, kind: input, shape index: {}]   ;;  %s119_s1 = inlined_call_operand.hbm [shape: f32[8,128], index: 1, kind: output, shape index: {}]  }
   0x1   :  { %7 = vsyncpa [#allocation4], 0  ;;  %s13_s8 = sshll.u32 %s118_s0, 4  ;;  %s99_s9 = smov [#allocation2]   ;;  %s14_s8 = int_to_ptr.hbm [resolvable:$true] %s13_s8 }
   0x2   :  { %s15_s10 = sshll.u32 %s99_s9, 4  ;;  %s16_s10 = int_to_ptr.vmem [resolvable:$true] %s15_s10 }
   0x3   :  { %18 = dma.hbm_to_vmem [thread:$0]  %s14_s8, 128, %s16_s10, [#allocation3]  }
   0x4   :  { %95 = dma.done.wait [#allocation3], 128  }
   0x5   :  { %96 = vsyncadd [#allocation3], 4294967168  ;;  %v23_v0 = vld [vmem:[#allocation2] sm:$0xff]  ;;  %s100_s11 = smov 1   ;;  %s101_s12 = smov [#allocation5]  }
   0x6   :  { %24 = vrot.lane.b32.xlu0 %v23_v0, %s100_s11  ;;  %s32_s13 = sshll.u32 %s101_s12, 4  ;;  %s34_s16 = sshll.u32 %s119_s1, 4  ;;  %s33_s13 = int_to_ptr.vmem [resolvable:$true] %s32_s13  ;;  %s35_s16 = int_to_ptr.hbm [resolvable:$true] %s34_s16 }
  0x78   :  { %v25_v1 = vpop.permute.xlu0 %24 }
  0x79   :  { %26 = vst [vmem:[#allocation5] sm:$0xff] %v25_v1 }
  0x7a   :  { %37 = dma.vmem_to_hbm [thread:$0]  %s33_s13, 128, %s35_s16, [#allocation4]  }
  0x7b   :  { %97 = dma.done.wait [#allocation4], 128  }
  0x7c   :  { %98 = vsyncadd [#allocation4], 4294967168 }
  0x7d   :  { %42 = vsyncpa [#allocation3], 1 }
  0x7e   :  { %43 = vsyncpa [#allocation4], 1 }

</bundles_post_ra>
